<compile_context>
chip_gen: v5e
topology: v5e:2x2
jax: 0.10.0
libtpu: 0.0.40
codegen_flags: <defaults>
</compile_context>

<pallas_src>
import math

import jax
import jax.numpy as jnp
from jax.experimental import pallas as pl
from jax.experimental.pallas import tpu as pltpu


def _actor_kernel(obs_ref, w1_ref, b1_ref, w2_ref, b2_ref, out_ref):
    # obs arrives as f32 (single HBM read); cast to bf16 in-register for MXU.
    x = obs_ref[...].astype(w1_ref.dtype)
    # First linear + ReLU. bf16 operands, f32 MXU accumulation.
    h = jnp.dot(x, w1_ref[...], preferred_element_type=jnp.float32)
    h = jnp.maximum(h + b1_ref[...], 0.0)
    # Second linear (cast h back to the weight dtype so the MXU runs bf16).
    o = jnp.dot(h.astype(w2_ref.dtype), w2_ref[...],
                preferred_element_type=jnp.float32) + b2_ref[...]
    # Row-wise L2 normalization (dim=1, keepdim) then scale by sqrt(action_size).
    sq = jnp.sum(o * o, axis=1, keepdims=True)     # XLU cross-lane reduce
    inv_norm = jax.lax.rsqrt(sq)                   # EUP slot (co-issues w/ VPU)
    scale = jnp.float32(math.sqrt(o.shape[1]))
    out_ref[...] = (o * inv_norm * scale).astype(out_ref.dtype)


def _round_up(x, m):
    return ((x + m - 1) // m) * m


def _cdiv(a, b):
    return -(-a // b)


def prepare_params(w1, b1, w2, b2, compute_dtype=jnp.bfloat16):
    """One-time parameter conversion (hoist out of the per-call hot path).

    w1: [S, H], w2: [H, A] (already transposed from PyTorch's [out, in]).
    Biases become (1, N) f32; weights become bf16 for the MXU.
    """
    H = w1.shape[1]
    A = w2.shape[1]
    return (w1.astype(compute_dtype),
            jnp.asarray(b1, jnp.float32).reshape(1, H),
            w2.astype(compute_dtype),
            jnp.asarray(b2, jnp.float32).reshape(1, A))


def all_kc_actor_forward(obs, w1, b1, w2, b2, *, block_b=None,
                         compute_dtype=jnp.bfloat16, out_dtype=jnp.float32):
    """obs: [B, S] f32. w1: [S, H], b1: [H] or [1, H], w2: [H, A], b2: [A] or [1, A].

    Set out_dtype=jnp.bfloat16 if the consumer tolerates it: output writeback
    is the dominant HBM term, so this is the biggest single roofline lever.
    """
    B, S = obs.shape
    H = w1.shape[1]
    A = w2.shape[1]

    # ---- Row-tile selection -------------------------------------------------
    # Big tiles (fewer grid steps -> less per-step overhead, larger DMAs), but
    # keep an even number (>= 2) of steps when B is non-trivial so the batch
    # axis shards across v7x's 2 TensorCores (no-op on v5e/v6e's single TC).
    if block_b is None:
        desired = 2048
        n_steps = max(1, _cdiv(B, desired))
        if B > 8:
            n_steps = max(n_steps, 2)
            if n_steps % 2:
                n_steps += 1
        block_b = _round_up(_cdiv(B, n_steps), 8)
    block_b = max(8, _round_up(block_b, 8))
    # Partial last block is fine: lane dim (A) stays dense; no pad/slice copies.
    grid = (_cdiv(B, block_b),)

    # ---- Parameters (no-op if already prepared via prepare_params) ----------
    w1_c = w1 if w1.dtype == compute_dtype else w1.astype(compute_dtype)
    w2_c = w2 if w2.dtype == compute_dtype else w2.astype(compute_dtype)
    b1_c = jnp.asarray(b1, jnp.float32).reshape(1, H)
    b2_c = jnp.asarray(b2, jnp.float32).reshape(1, A)
    obs_in = obs  # no wrapper-side cast: f32 -> bf16 happens inside the kernel

    # ---- Honest, lane-padding-aware VMEM limit -------------------------------
    lane = 128
    obs_isz = jnp.dtype(obs_in.dtype).itemsize
    w_isz = jnp.dtype(compute_dtype).itemsize
    out_isz = jnp.dtype(out_dtype).itemsize
    obs_tile = block_b * _round_up(S, lane) * obs_isz
    out_tile = block_b * _round_up(A, lane) * out_isz
    w1_tile = _round_up(S, 16) * _round_up(H, lane) * w_isz
    w2_tile = _round_up(H, 16) * _round_up(A, lane) * w_isz
    b_tiles = 8 * (_round_up(H, lane) + _round_up(A, lane)) * 4
    interm = block_b * (_round_up(H, lane) + 2 * _round_up(A, lane)) * 4
    vmem_bytes = int(2 * (obs_tile + out_tile)            # pipelined in/out
                     + 2 * (w1_tile + w2_tile + b_tiles)  # grid-constant (2-buf)
                     + interm                             # h / o / o*o temps
                     + (6 << 20))                         # headroom

    cost = pl.CostEstimate(
        flops=2 * B * (S * H + H * A),
        transcendentals=B,                                # one rsqrt per row
        bytes_accessed=(obs_in.size * obs_isz
                        + w1_c.size * w_isz + w2_c.size * w_isz
                        + (H + A) * 4
                        + B * A * out_isz),
    )

    return pl.pallas_call(
        _actor_kernel,
        out_shape=jax.ShapeDtypeStruct((B, A), out_dtype),
        grid_spec=pltpu.PrefetchScalarGridSpec(
            num_scalar_prefetch=0,
            grid=grid,
            in_specs=[
                pl.BlockSpec((block_b, S), lambda i: (i, 0)),  # obs tile (pipelined)
                pl.BlockSpec((S, H), lambda i: (0, 0)),        # W1 (grid-constant)
                pl.BlockSpec((1, H), lambda i: (0, 0)),        # b1
                pl.BlockSpec((H, A), lambda i: (0, 0)),        # W2
                pl.BlockSpec((1, A), lambda i: (0, 0)),        # b2
            ],
            out_specs=pl.BlockSpec((block_b, A), lambda i: (i, 0)),
        ),
        compiler_params=pltpu.CompilerParams(
            dimension_semantics=("parallel",),
            vmem_limit_bytes=vmem_bytes,
        ),
        cost_estimate=cost,
    )(obs_in, w1_c, b1_c, w2_c, b2_c)


def reference_forward(obs, w1, b1, w2, b2):
    h = jnp.maximum(obs @ w1 + b1.reshape(1, -1), 0.0)
    o = h @ w2 + b2.reshape(1, -1)
    norms = jnp.sqrt(jnp.sum(o * o, axis=1, keepdims=True))
    return o / norms * jnp.sqrt(jnp.float32(o.shape[1]))


if __name__ == "__main__":
    # Small shapes consistent with the module:
    #   batch=8, student_hidden_size=32, hidden_size=32, action_size=128.
    B, S, H, A = 8, 32, 32, 128

    key = jax.random.PRNGKey(0)
    k_obs, k_w1, k_b1, k_w2, k_b2 = jax.random.split(key, 5)

    obs = jax.random.normal(k_obs, (B, S), dtype=jnp.float32)

    # Deterministic init mimicking nn.Linear's uniform(-1/sqrt(fan_in), 1/sqrt(fan_in)).
    bound1 = 1.0 / math.sqrt(S)
    w1 = jax.random.uniform(k_w1, (S, H), jnp.float32, -bound1, bound1)
    b1 = jax.random.uniform(k_b1, (1, H), jnp.float32, -bound1, bound1)
    bound2 = 1.0 / math.sqrt(H)
    w2 = jax.random.uniform(k_w2, (H, A), jnp.float32, -bound2, bound2)
    b2 = jax.random.uniform(k_b2, (1, A), jnp.float32, -bound2, bound2)

    # One-time param conversion hoisted out of the hot path (perf feedback).
    w1_c, b1_c, w2_c, b2_c = prepare_params(w1, b1, w2, b2)

    # --- Small-shape run -----------------------------------------------------
    out = jax.block_until_ready(all_kc_actor_forward(obs, w1_c, b1_c, w2_c, b2_c))
    ref = reference_forward(obs, w1, b1, w2, b2)
    assert out.shape == (B, A)
    # bf16 matmuls vs f32 reference: loosened tolerance.
    assert jnp.allclose(out, ref, atol=5e-2, rtol=5e-2), "small-batch mismatch"
    # Row norms must equal sqrt(action_size).
    row_norms = jnp.sqrt(jnp.sum(out * out, axis=1))
    assert jnp.allclose(row_norms, jnp.sqrt(jnp.float32(A)), atol=1e-2, rtol=1e-2)

    # --- Multi-tile path: B not a multiple of block_b -> partial last block
    #     (no pad / no out[:B] copy), 2 even grid steps for v7x's 2 TCs. ------
    B2 = 600
    obs2 = jax.random.normal(jax.random.PRNGKey(1), (B2, S), dtype=jnp.float32)
    out2 = jax.block_until_ready(all_kc_actor_forward(obs2, w1_c, b1_c, w2_c, b2_c))
    ref2 = reference_forward(obs2, w1, b1, w2, b2)
    assert out2.shape == (B2, A)
    assert jnp.allclose(out2, ref2, atol=5e-2, rtol=5e-2), "multi-tile mismatch"

    # --- Optional bf16 output path (halves the dominant writeback traffic). --
    out3 = jax.block_until_ready(
        all_kc_actor_forward(obs2, w1_c, b1_c, w2_c, b2_c, out_dtype=jnp.bfloat16))
    assert out3.dtype == jnp.bfloat16
    assert jnp.allclose(out3.astype(jnp.float32), ref2, atol=8e-2, rtol=8e-2)

    state = None  # module returns (output, state) with state untouched

    print("KERNEL_OK")
</pallas_src>

<mosaic_0001>
module attributes {stable_mosaic.version = 11 : i64} {
  func.func @_actor_kernel(%arg0: i32, %arg1: memref<8x32xf32, #tpu.memory_space<vmem>>, %arg2: memref<32x32xbf16, #tpu.memory_space<vmem>>, %arg3: memref<1x32xf32, #tpu.memory_space<vmem>>, %arg4: memref<32x128xbf16, #tpu.memory_space<vmem>>, %arg5: memref<1x128xf32, #tpu.memory_space<vmem>>, %arg6: memref<8x128xf32, #tpu.memory_space<vmem>>) attributes {dimension_semantics = [#tpu.dimension_semantics<parallel>], iteration_bounds = array<i64: 1>, scalar_prefetch = 0 : i64, scratch_operands = 0 : i64, tpu.core_type = #tpu.core_type<tc>, window_params = [{transform_indices = @transform_0, window_bounds = array<i64: 8, 32>}, {pipeline_mode = #tpu.pipeline_mode<synchronous>, transform_indices = @transform_1, window_bounds = array<i64: 32, 32>}, {pipeline_mode = #tpu.pipeline_mode<synchronous>, transform_indices = @transform_2, window_bounds = array<i64: 1, 32>}, {pipeline_mode = #tpu.pipeline_mode<synchronous>, transform_indices = @transform_3, window_bounds = array<i64: 32, 128>}, {pipeline_mode = #tpu.pipeline_mode<synchronous>, transform_indices = @transform_4, window_bounds = array<i64: 1, 128>}, {transform_indices = @transform_5, window_bounds = array<i64: 8, 128>}]} {
    %c0 = arith.constant 0 : index
    %c0_0 = arith.constant 0 : index
    %0 = vector.load %arg1[%c0, %c0_0] : memref<8x32xf32, #tpu.memory_space<vmem>>, vector<8x32xf32>
    %1 = arith.truncf %0 : vector<8x32xf32> to vector<8x32xbf16>
    %c0_1 = arith.constant 0 : index
    %c0_2 = arith.constant 0 : index
    %2 = vector.load %arg2[%c0_1, %c0_2] : memref<32x32xbf16, #tpu.memory_space<vmem>>, vector<32x32xbf16>
    %cst = arith.constant dense<0.000000e+00> : vector<8x32xf32>
    %3 = tpu.matmul %1, %2, %cst {dimension_numbers = #tpu.dot_dimension_numbers<[1], [0], [0], [1], [0, 0, 1, 1], [], []>} : vector<8x32xbf16>, vector<32x32xbf16>, vector<8x32xf32> -> vector<8x32xf32>
    %c0_3 = arith.constant 0 : index
    %c0_4 = arith.constant 0 : index
    %4 = vector.load %arg3[%c0_3, %c0_4] : memref<1x32xf32, #tpu.memory_space<vmem>>, vector<1x32xf32>
    %5 = vector.broadcast %4 : vector<1x32xf32> to vector<8x32xf32>
    %6 = arith.addf %3, %5 : vector<8x32xf32>
    %cst_5 = arith.constant 0.000000e+00 : f32
    %7 = vector.broadcast %cst_5 : f32 to vector<8x32xf32>
    %8 = arith.maximumf %6, %7 : vector<8x32xf32>
    %9 = arith.truncf %8 : vector<8x32xf32> to vector<8x32xbf16>
    %c0_6 = arith.constant 0 : index
    %c0_7 = arith.constant 0 : index
    %10 = vector.load %arg4[%c0_6, %c0_7] : memref<32x128xbf16, #tpu.memory_space<vmem>>, vector<32x128xbf16>
    %cst_8 = arith.constant dense<0.000000e+00> : vector<8x128xf32>
    %11 = tpu.matmul %9, %10, %cst_8 {dimension_numbers = #tpu.dot_dimension_numbers<[1], [0], [0], [1], [0, 0, 1, 1], [], []>} : vector<8x32xbf16>, vector<32x128xbf16>, vector<8x128xf32> -> vector<8x128xf32>
    %c0_9 = arith.constant 0 : index
    %c0_10 = arith.constant 0 : index
    %12 = vector.load %arg5[%c0_9, %c0_10] : memref<1x128xf32, #tpu.memory_space<vmem>>, vector<1x128xf32>
    %13 = vector.broadcast %12 : vector<1x128xf32> to vector<8x128xf32>
    %14 = arith.addf %11, %13 : vector<8x128xf32>
    %15 = arith.mulf %14, %14 : vector<8x128xf32>
    %cst_11 = arith.constant dense<0.000000e+00> : vector<8xf32>
    %16 = vector.multi_reduction <add>, %15, %cst_11 [1] : vector<8x128xf32> to vector<8xf32>
    %17 = vector.shape_cast %16 : vector<8xf32> to vector<8x1xf32>
    %18 = math.rsqrt %17 : vector<8x1xf32>
    %19 = vector.broadcast %18 : vector<8x1xf32> to vector<8x128xf32>
    %20 = arith.mulf %14, %19 : vector<8x128xf32>
    %cst_12 = arith.constant 11.3137083 : f32
    %21 = vector.broadcast %cst_12 : f32 to vector<8x128xf32>
    %22 = arith.mulf %20, %21 : vector<8x128xf32>
    %c0_13 = arith.constant 0 : index
    %c0_14 = arith.constant 0 : index
    %23 = vector.load %arg6[%c0_13, %c0_14] : memref<8x128xf32, #tpu.memory_space<vmem>>, vector<8x128xf32>
    tpu.vector_store %arg6[%c0_13, %c0_14], %22 {strides = array<i32>} : memref<8x128xf32, #tpu.memory_space<vmem>>, vector<8x128xf32>,
    return
  }
  func.func @transform_0(%arg0: i32) -> (i32, i32) {
    %c0_i32 = arith.constant 0 : i32
    %c0_i32_0 = arith.constant 0 : i32
    return %arg0, %c0_i32 : i32, i32
  }
  func.func @transform_1(%arg0: i32) -> (i32, i32) {
    %c0_i32 = arith.constant 0 : i32
    %c0_i32_0 = arith.constant 0 : i32
    %c0_i32_1 = arith.constant 0 : i32
    return %c0_i32, %c0_i32_0 : i32, i32
  }
  func.func @transform_2(%arg0: i32) -> (i32, i32) {
    %c0_i32 = arith.constant 0 : i32
    %c0_i32_0 = arith.constant 0 : i32
    %c0_i32_1 = arith.constant 0 : i32
    return %c0_i32, %c0_i32_0 : i32, i32
  }
  func.func @transform_3(%arg0: i32) -> (i32, i32) {
    %c0_i32 = arith.constant 0 : i32
    %c0_i32_0 = arith.constant 0 : i32
    %c0_i32_1 = arith.constant 0 : i32
    return %c0_i32, %c0_i32_0 : i32, i32
  }
  func.func @transform_4(%arg0: i32) -> (i32, i32) {
    %c0_i32 = arith.constant 0 : i32
    %c0_i32_0 = arith.constant 0 : i32
    %c0_i32_1 = arith.constant 0 : i32
    return %c0_i32, %c0_i32_0 : i32, i32
  }
  func.func @transform_5(%arg0: i32) -> (i32, i32) {
    %c0_i32 = arith.constant 0 : i32
    %c0_i32_0 = arith.constant 0 : i32
    return %arg0, %c0_i32 : i32, i32
  }
}

</mosaic_0001>

<bundles_post_ra>
// kernel: tpu_custom_call.1
= control target key start
LH: loop header
LB: loop body
LE: loop exit
PB: predicated region body
PF: predicated region fallthrough
CT: control target
= control target key end

     0   :  { %10 = vsyncpa [#allocation3], 0  ;;  %s366_s0 = inlined_call_operand.hbm [shape: f32[8,32], index: 0, kind: input, shape index: {}]   ;;  %s367_s1 = inlined_call_operand.hbm [shape: bf16[32,32], index: 1, kind: input, shape index: {}]   ;;  %s368_s2 = inlined_call_operand.vmem [shape: f32[1,32], index: 2, kind: input, shape index: {}]   ;;  %s369_s3 = inlined_call_operand.hbm [shape: bf16[32,128], index: 3, kind: input, shape index: {}]   ;;  %s370_s4 = inlined_call_operand.vmem [shape: f32[1,128], index: 4, kind: input, shape index: {}]   ;;  %s371_s5 = inlined_call_operand.hbm [shape: f32[8,128], index: 5, kind: output, shape index: {}]  }
   0x1   :  { %11 = vsyncpa [#allocation6], 0  ;;  %s28_s20 = sshll.u32 %s367_s1, 4  ;;  %s29_s20 = int_to_ptr.hbm [resolvable:$true] %s28_s20 }
   0x2   :  { %12 = vsyncpa [#allocation4], 0  ;;  %s312_s21 = smov [#allocation5]   ;;  %s18_s25 = sshll.u32 %s366_s0, 4  ;;  %s19_s25 = int_to_ptr.hbm [resolvable:$true] %s18_s25 }
   0x3   :  { %s30_s22 = sshll.u32 %s312_s21, 4  ;;  %s313_s26 = smov 64   ;;  %s31_s22 = int_to_ptr.vmem [resolvable:$true] %s30_s22 }
   0x4   :  { %s314_s27 = smov 4   ;;  %s315_s28 = smov [#allocation2]  }
   0x5   :  { %36 = dma.hbm_to_vmem [thread:$0]  %s29_s20, 256, %s31_s22, [#allocation6], %s313_s26, %s313_s26, %s314_s27  }
   0x6   :  { %s20_s29 = sshll.u32 %s315_s28, 4  ;;  %s43_s7 = sshll.u32 %s369_s3, 4  ;;  %s21_s29 = int_to_ptr.vmem [resolvable:$true] %s20_s29  ;;  %s44_s7 = int_to_ptr.hbm [resolvable:$true] %s43_s7 }
   0x7   :  { %23 = dma.hbm_to_vmem [thread:$0]  %s19_s25, 128, %s21_s29, [#allocation3]  }
   0x8   :  { %s316_s1 = smov [#allocation7]  }
   0x9   :  { %s45_s8 = sshll.u32 %s316_s1, 4  ;;  %s46_s8 = int_to_ptr.vmem [resolvable:$true] %s45_s8 }
   0xa   :  { %51 = dma.hbm_to_vmem [thread:$0]  %s44_s7, 256, %s46_s8, [#allocation6], %s313_s26, %s313_s26, %s314_s27  }
   0xb   :  { %306 = dma.done.wait [#allocation3], 128  }
   0xc   :  { %307 = vsyncadd [#allocation3], 4294967168 }
   0xd   :  { %308 = dma.done.wait [#allocation6], 512  }
   0xe   :  { %309 = vsyncadd [#allocation6], 4294966784  ;;  %v197_v0 = vld [vmem:[#allocation5 + $0x8] sm:$0xff]  ;;  %v196_v1 = vld [vmem:[#allocation5] sm:$0xff]  ;;  %vm89_vm0 = vcmask 261120   ;;  %s167_s13 = sshll.u32 %s371_s5, 4  ;;  %s168_s13 = int_to_ptr.hbm [resolvable:$true] %s167_s13 }
   0xf   :  { %99 = vmatpush.bf16.msra.mxu0 %v197_v0  ;;  %v67_v2 = vld [vmem:[#allocation2] sm:$0xff]  ;;  %v198_v5 = vld [vmem:[#allocation7] sm:$0xff] }
  0x10   :  { %v68_v3 = vpack.c.bf16 %v67_v2, %v67_v2  ;;  %v199_v4 = vld [vmem:[#allocation7 + $0x8] sm:$0xff] }
  0x11   :  { %137 = vmatpush.bf16.msra.mxu1 %v199_v4  ;;  %v206_v6 = vld [vmem:[%s368_s2] ss:$0 sm:$0xff]  ;;  %s317_s2 = smov [#allocation8]  }
  0x12   :  { %v207_v12 = vld [vmem:[%s370_s4] ss:$0 sm:$0xff]  ;;  %s165_s11 = sshll.u32 %s317_s2, 4  ;;  %s166_s11 = int_to_ptr.vmem [resolvable:$true] %s165_s11 }
  0x13   :  { %100 = vmatpush.bf16.msra.mxu0 %v196_v1 }
  0x15   :  { %138 = vmatpush.bf16.msra.mxu1 %v198_v5 }
  0x16   :  { %186 = vmatmul.msk.bf16.vlgmr.msra.gmra.mxu0 %vm89_vm0, %v68_v3 }
  0x93   :  { %v102_v7 = vpop.f32.mrf.mxu0 }
  0x94   :  { %v103_v8 = vadd.f32 %v206_v6, %v102_v7 }
  0x96   :  { %v106_v9 = vmax.f32 %v103_v8, 0.0 }
  0x98   :  { %v107_v10 = vpack.c.bf16 %v106_v9, %v106_v9 }
  0x9a   :  { %195 = vmatmul.msk.bf16.vlgmr.msra.gmra.mxu1 %vm89_vm0, %v107_v10 }
  0x9b   :  { %v104_v11 = vpop.f32.mrf.mxu0 }
 0x117   :  { %v140_v13 = vpop.f32.mrf.mxu1 }
 0x118   :  { %v141_v14 = vadd.f32 %v207_v12, %v140_v13 }
 0x11a   :  { %v144_v15 = vmul.f32 %v141_v14, %v141_v14 }
 0x11c   :  { %145 = vadd.xlane.f32.xlu0 %v144_v15 }
 0x11f   :  { %v142_v16 = vpop.f32.mrf.mxu1 }
 0x18f   :  { %v146_v17 = vpop.xlane.xlu0 %145 }
 0x190   :  { %208 = vrsqrt.f32 %v146_v17  ;;  %vm153_vm2 = vweird.f32 %v146_v17 }
 0x196   :  { %v209_v18 = vpop.eup %208 }
 0x197   :  { %v148_v19 = vmul.f32 %v209_v18, %v146_v17  ;;  %vm154_vm1 = vweird.f32 %v209_v18 }
 0x198   :  { %vm155_vm3 = vmor %vm153_vm2, %vm154_vm1 }
 0x199   :  { %v149_v20 = vmul.f32 %v209_v18, %v148_v19 }
 0x19b   :  { %v150_v21 = vmul.f32 0.5, %v149_v20 }
 0x19d   :  { %v151_v22 = vsub.f32 1.5, %v150_v21 }
 0x19f   :  { %v152_v23 = vmul.f32 %v209_v18, %v151_v22 }
 0x1a1   :  { %v156_v24 = vsel %vm155_vm3, %v209_v18, %v152_v23 }
 0x1a2   :  { %v157_v25 = vmul.f32 %v156_v24, %v141_v14 }
 0x1a4   :  { %v158_v26 = vmul.f32 11.313708, %v157_v25 }
 0x1a6   :  { %159 = vst [vmem:[#allocation8] sm:$0xff] %v158_v26 }
 0x1a7   :  { %170 = dma.vmem_to_hbm [thread:$0]  %s166_s11, 128, %s168_s13, [#allocation4]  }
 0x1a8   :  { %310 = dma.done.wait [#allocation4], 128  }
 0x1a9   :  { %311 = vsyncadd [#allocation4], 4294967168 }
 0x1aa   :  { %175 = vsyncpa [#allocation3], 1 }
 0x1ab   :  { %176 = vsyncpa [#allocation6], 1 }
 0x1ac   :  { %177 = vsyncpa [#allocation4], 1 }

</bundles_post_ra>
